<compile_context>
chip_gen: v7x
topology: tpu7x:2x2x1
jax: 0.10.0
libtpu: 0.0.40
codegen_flags: <defaults>
</compile_context>

<pallas_src>
import functools

import numpy as np
import jax
import jax.numpy as jnp
from jax import lax
from jax.experimental import pallas as pl
from jax.experimental.pallas import tpu as pltpu

# > v5e's 16 MiB / v6e-v7x's 32 MiB scoped defaults, < v7x's 64 MiB physical VMEM.
_VMEM_LIMIT_BYTES = 48 * 1024 * 1024


# ---------------------------------------------------------------------------
# Helpers
# ---------------------------------------------------------------------------

def _round_up(x, m):
    return ((x + m - 1) // m) * m


def _pick_tile(size, max_tile, align, min_tiles=1):
    """Pick a tile (multiple of `align`) and the padded extent it divides.
    min_tiles > 1 requests at least that many grid steps along the axis so
    v7x's two TensorCores both get work on 'parallel' axes."""
    padded = _round_up(size, align)
    tile = min(max_tile, padded)
    if min_tiles > 1 and padded >= min_tiles * align:
        cap = _round_up(-(-padded // min_tiles), align)
        tile = min(tile, cap)
    padded = _round_up(padded, tile)
    return padded, tile


def _pad2d(a, rows, cols):
    r, c = a.shape
    return jnp.pad(a.astype(jnp.float32), ((0, rows - r), (0, cols - c)))


def _augment(x, gamma, d_aug, rows_pad, side):
    """Fold the RBF row-norm terms into two extra feature columns so the entire
    exponent comes out of a single MXU matmul:
        side 'a': a_i = [2*gamma*x_i, -gamma*||x_i||^2, 1]
        side 'b': b_j = [x_j,          1,               -gamma*||x_j||^2]
        a_i . b_j = -gamma * ||x_i - x_j||^2
    Padded rows are all-zero => exponent 0 (exp = 1) for padded pairs; those rows/cols
    are sliced off (or neutralized by zero alpha rows) downstream."""
    m, d = x.shape
    x32 = x.astype(jnp.float32)
    sq = jnp.sum(x32 * x32, axis=1, keepdims=True)
    ones = jnp.ones((m, 1), jnp.float32)
    if side == "a":
        aug = jnp.concatenate([2.0 * gamma * x32, -gamma * sq, ones], axis=1)
    else:
        aug = jnp.concatenate([x32, ones, -gamma * sq], axis=1)
    return jnp.pad(aug, ((0, rows_pad - m), (0, d_aug - (d + 2))))


# ---------------------------------------------------------------------------
# Pallas kernels
# ---------------------------------------------------------------------------

def _rbf_gram_kernel(xa_ref, zb_ref, ridge_ref, o_ref, *, tm, tn, add_ridge):
    """o[i, j] = exp(min(a_i . b_j, 0)) (+ ridge on the true diagonal).
    Augmented-column inputs make a_i . b_j == -gamma * ||x_i - z_j||^2."""
    arg = lax.dot_general(
        xa_ref[...], zb_ref[...],
        dimension_numbers=(((1,), (1,)), ((), ())),      # contract feature (lane) axis
        precision=lax.Precision.HIGHEST,                 # K_xx feeds the linear solve
        preferred_element_type=jnp.float32)
    o_ref[...] = jnp.exp(jnp.minimum(arg, 0.0))

    if add_ridge:
        i = pl.program_id(0)
        j = pl.program_id(1)
        row0 = i * tm
        col0 = j * tn

        @pl.when((row0 < col0 + tn) & (col0 < row0 + tm))   # tile crosses the diagonal
        def _():
            rows = row0 + lax.broadcasted_iota(jnp.int32, (tm, tn), 0)
            cols = col0 + lax.broadcasted_iota(jnp.int32, (tm, tn), 1)
            o_ref[...] += jnp.where(rows == cols, ridge_ref[...], 0.0)


def _krr_predict_kernel(xte_ref, xtr_ref, alpha_ref, o_ref, *,
                        tn, alpha_resident, mm_dtype):
    """Fused K_xXtest tile * alpha slice, accumulated into the resident output block.
    Grid axis 1 (train tiles) is the reduction axis."""
    j = pl.program_id(1)

    @pl.when(j == 0)
    def _():
        o_ref[...] = jnp.zeros_like(o_ref)

    arg = lax.dot_general(
        xte_ref[...], xtr_ref[...],
        dimension_numbers=(((1,), (1,)), ((), ())),       # bf16 in, f32 acc (MXU)
        preferred_element_type=jnp.float32)
    gram = jnp.exp(jnp.minimum(arg, 0.0)).astype(mm_dtype)   # values in [0,1]

    if alpha_resident:
        start = pl.multiple_of(j * tn, tn)
        a_blk = alpha_ref[pl.ds(start, tn), :]            # whole alpha lives in VMEM
    else:
        a_blk = alpha_ref[...]                            # streamed (tn, y_pad) slice
    o_ref[...] += jnp.dot(gram, a_blk, preferred_element_type=jnp.float32)


# ---------------------------------------------------------------------------
# Wrappers
# ---------------------------------------------------------------------------

def rbf_gram(x, z, lengthscale, ridge=None, *, tile_m=512, tile_n=512):
    """Tiled RBF gram matrix exp(-||x_i - z_j||^2 / (2 ls^2)), optionally + ridge*I."""
    m, d = x.shape
    n, _ = z.shape
    gamma = 1.0 / (2.0 * lengthscale * lengthscale)

    d_aug = _round_up(d + 2, 128)                       # lane-dense augmented features
    m_pad, tm = _pick_tile(m, tile_m, 8, min_tiles=2)   # parallel rows: >=2 tiles (v7x)
    n_pad, tn = _pick_tile(n, tile_n, 128)              # lane-dense output columns

    xa = _augment(x, gamma, d_aug, m_pad, side="a")     # f32: feeds the solve
    zb = _augment(z, gamma, d_aug, n_pad, side="b")
    ridge_arr = jnp.asarray(0.0 if ridge is None else ridge, jnp.float32).reshape(1, 1)

    kernel = functools.partial(_rbf_gram_kernel, tm=tm, tn=tn,
                               add_ridge=ridge is not None)
    out = pl.pallas_call(
        kernel,
        out_shape=jax.ShapeDtypeStruct((m_pad, n_pad), jnp.float32),
        grid_spec=pltpu.PrefetchScalarGridSpec(
            num_scalar_prefetch=0,
            grid=(m_pad // tm, n_pad // tn),
            in_specs=[
                pl.BlockSpec((tm, d_aug), lambda i, j: (i, 0)),   # augmented x rows
                pl.BlockSpec((tn, d_aug), lambda i, j: (j, 0)),   # augmented z rows
                pl.BlockSpec((1, 1), lambda i, j: (0, 0)),        # ridge scalar
            ],
            out_specs=pl.BlockSpec((tm, tn), lambda i, j: (i, j)),
        ),
        compiler_params=pltpu.CompilerParams(
            dimension_semantics=("parallel", "parallel"),
            vmem_limit_bytes=_VMEM_LIMIT_BYTES),
    )(xa, zb, ridge_arr)
    return out[:m, :n]


def krr_predict(Xtest, Xtrain, alpha, lengthscale, *, tile_m=512, tile_n=512,
                stream_dtype=jnp.bfloat16):
    """Fused (K_xXtest @ alpha) — the test gram never touches HBM. Streamed operands
    (Xtest, Xtrain, alpha) are cast to bf16; accumulation stays f32."""
    m, d = Xtest.shape
    n, _ = Xtrain.shape
    y = alpha.shape[1]
    gamma = 1.0 / (2.0 * lengthscale * lengthscale)

    d_aug = _round_up(d + 2, 128)
    row_align = 16 if stream_dtype == jnp.bfloat16 else 8
    m_pad, tm = _pick_tile(m, tile_m, row_align, min_tiles=2)   # parallel test rows
    n_pad, tn = _pick_tile(n, tile_n, 128)                      # train reduction axis
    y_pad = _round_up(y, 128)                                   # lane-dense output

    xte = _augment(Xtest, gamma, d_aug, m_pad, side="a").astype(stream_dtype)
    xtr = _augment(Xtrain, gamma, d_aug, n_pad, side="b").astype(stream_dtype)
    # Zero-padded alpha rows neutralize padded train columns (exact zeros in bf16 too).
    a_p = _pad2d(alpha, n_pad, y_pad).astype(stream_dtype)

    alpha_resident = n_pad * y_pad * a_p.dtype.itemsize <= 4 * 1024 * 1024
    if alpha_resident:
        a_spec = pl.BlockSpec((n_pad, y_pad), lambda i, j: (0, 0))   # fetched once
    else:
        a_spec = pl.BlockSpec((tn, y_pad), lambda i, j: (j, 0))      # streamed slice

    kernel = functools.partial(_krr_predict_kernel, tn=tn,
                               alpha_resident=alpha_resident, mm_dtype=stream_dtype)
    out = pl.pallas_call(
        kernel,
        out_shape=jax.ShapeDtypeStruct((m_pad, y_pad), jnp.float32),
        grid_spec=pltpu.PrefetchScalarGridSpec(
            num_scalar_prefetch=0,
            grid=(m_pad // tm, n_pad // tn),                        # j = reduction
            in_specs=[
                pl.BlockSpec((tm, d_aug), lambda i, j: (i, 0)),     # Xtest tile (bf16)
                pl.BlockSpec((tn, d_aug), lambda i, j: (j, 0)),     # Xtrain tile (bf16)
                a_spec,                                             # alpha (bf16)
            ],
            out_specs=pl.BlockSpec((tm, y_pad), lambda i, j: (i, 0)),  # resident acc
        ),
        compiler_params=pltpu.CompilerParams(
            dimension_semantics=("parallel", "arbitrary"),
            vmem_limit_bytes=_VMEM_LIMIT_BYTES),
    )(xte, xtr, a_p)
    return out[:m, :y]


class KRRFunctional:
    """JAX/Pallas re-implementation of the PyTorch KRRFunctional (RBF kernel)."""

    def __init__(self, penalty=0.01, reg=1e-6):
        self.reg = reg
        # Deterministic parameter init matching the PyTorch __init__:
        self.log_lengthscale = jnp.asarray(0.0, jnp.float32)           # lengthscale = 1
        self.log_penalty = jnp.asarray(np.log(penalty), jnp.float32)

    @property
    def lengthscale(self):
        return jnp.exp(self.log_lengthscale)

    @property
    def penalty(self):
        return jnp.exp(self.log_penalty)

    def forward(self, Ytrain, Xtrain, Xtest):
        ls = self.lengthscale
        ridge = self.penalty + self.reg
        # K_xx + ridge*I produced directly by the Pallas kernel (no eye/add in XLA).
        K_reg = rbf_gram(Xtrain, Xtrain, ls, ridge=ridge)
        # TODO(synk): dense SPD solve has no clean Pallas equivalent; SPD-aware
        # Cholesky in XLA (K_xx + ridge*I is SPD by construction).
        c, low = jax.scipy.linalg.cho_factor(K_reg, lower=True)
        alpha = jax.scipy.linalg.cho_solve((c, low), Ytrain.astype(jnp.float32))
        # Fused test-gram + matmul, bf16 streams, f32 accumulation.
        return krr_predict(Xtest, Xtrain, alpha, ls)


# ---------------------------------------------------------------------------
# Main
# ---------------------------------------------------------------------------

if __name__ == "__main__":
    key = jax.random.PRNGKey(0)
    k1, k2, k3 = jax.random.split(key, 3)

    n_train, n_test, d, y_dim = 48, 24, 8, 2
    Xtrain = jax.random.normal(k1, (n_train, d), dtype=jnp.float32)
    Xtest = jax.random.normal(k2, (n_test, d), dtype=jnp.float32)
    Ytrain = jax.random.normal(k3, (n_train, y_dim), dtype=jnp.float32)

    model = KRRFunctional(penalty=0.01, reg=1e-6)
    out = jax.block_until_ready(model.forward(Ytrain, Xtrain, Xtest))

    # Pure-JAX reference (mirrors the PyTorch module; exact pairwise distances).
    def ref_gram(x, z, ls):
        sq = jnp.sum((x[:, None, :] - z[None, :, :]) ** 2, axis=-1)
        return jnp.exp(-jnp.maximum(sq, 0.0) / (2.0 * ls * ls))

    ls = model.lengthscale
    ridge = model.penalty + model.reg
    K_ref = ref_gram(Xtrain, Xtrain, ls) + ridge * jnp.eye(n_train, dtype=jnp.float32)
    alpha_ref = jnp.linalg.solve(K_ref, Ytrain)
    out_ref = jnp.matmul(ref_gram(Xtest, Xtrain, ls), alpha_ref,
                         precision=lax.Precision.HIGHEST)

    # Tight check on the f32/HIGHEST gram kernel (includes the fused ridge).
    K_pallas = jax.block_until_ready(rbf_gram(Xtrain, Xtrain, ls, ridge=ridge))
    np.testing.assert_allclose(np.asarray(K_pallas), np.asarray(K_ref),
                               rtol=1e-4, atol=1e-4)

    # End-to-end check: the prediction path intentionally streams bf16 (perf review),
    # so tolerances reflect bf16 input rounding; structure is validated above in f32.
    assert out.shape == (n_test, y_dim)
    np.testing.assert_allclose(np.asarray(out), np.asarray(out_ref),
                               rtol=5e-2, atol=5e-2)
    print("KERNEL_OK")
</pallas_src>

<mosaic_0001>
module attributes {stable_mosaic.version = 11 : i64} {
  func.func @_rbf_gram_kernel(%arg0: i32, %arg1: i32, %arg2: memref<24x128xf32, #tpu.memory_space<vmem>>, %arg3: memref<128x128xf32, #tpu.memory_space<vmem>>, %arg4: memref<1x1xf32, #tpu.memory_space<vmem>>, %arg5: memref<24x128xf32, #tpu.memory_space<vmem>>) attributes {dimension_semantics = [#tpu.dimension_semantics<parallel>, #tpu.dimension_semantics<parallel>], iteration_bounds = array<i64: 2, 1>, scalar_prefetch = 0 : i64, scratch_operands = 0 : i64, tpu.core_type = #tpu.core_type<tc>, window_params = [{transform_indices = @transform_0, window_bounds = array<i64: 24, 128>}, {transform_indices = @transform_1, window_bounds = array<i64: 128, 128>}, {pipeline_mode = #tpu.pipeline_mode<synchronous>, transform_indices = @transform_2, window_bounds = array<i64: 1, 1>}, {transform_indices = @transform_3, window_bounds = array<i64: 24, 128>}]} {
    %c0 = arith.constant 0 : index
    %c0_0 = arith.constant 0 : index
    %0 = vector.load %arg2[%c0, %c0_0] : memref<24x128xf32, #tpu.memory_space<vmem>>, vector<24x128xf32>
    %c0_1 = arith.constant 0 : index
    %c0_2 = arith.constant 0 : index
    %1 = vector.load %arg3[%c0_1, %c0_2] : memref<128x128xf32, #tpu.memory_space<vmem>>, vector<128x128xf32>
    %cst = arith.constant dense<0.000000e+00> : vector<24x128xf32>
    %2 = tpu.matmul %0, %1, %cst {dimension_numbers = #tpu.dot_dimension_numbers<[1], [1], [0], [0], [0, 0, 1, 0], [], []>, precision = #tpu.contract_precision<fp32>} : vector<24x128xf32>, vector<128x128xf32>, vector<24x128xf32> -> vector<24x128xf32>
    %cst_3 = arith.constant 0.000000e+00 : f32
    %3 = vector.broadcast %cst_3 : f32 to vector<24x128xf32>
    %4 = arith.minimumf %2, %3 : vector<24x128xf32>
    %5 = math.exp %4 : vector<24x128xf32>
    %c0_4 = arith.constant 0 : index
    %c0_5 = arith.constant 0 : index
    %6 = vector.load %arg5[%c0_4, %c0_5] : memref<24x128xf32, #tpu.memory_space<vmem>>, vector<24x128xf32>
    tpu.vector_store %arg5[%c0_4, %c0_5], %5 {strides = array<i32>} : memref<24x128xf32, #tpu.memory_space<vmem>>, vector<24x128xf32>,
    %c24_i32 = arith.constant 24 : i32
    %7 = arith.muli %arg0, %c24_i32 : i32
    %c128_i32 = arith.constant 128 : i32
    %8 = arith.muli %arg1, %c128_i32 : i32
    %c128_i32_6 = arith.constant 128 : i32
    %9 = arith.addi %8, %c128_i32_6 : i32
    %10 = arith.cmpi slt, %7, %9 : i32
    %c24_i32_7 = arith.constant 24 : i32
    %11 = arith.addi %7, %c24_i32_7 : i32
    %12 = arith.cmpi slt, %8, %11 : i32
    %13 = arith.andi %10, %12 : i1
    %14 = arith.extui %13 : i1 to i32
    %c0_i32 = arith.constant 0 : i32
    %15 = arith.cmpi ne, %14, %c0_i32 : i32
    scf.if %15 {
      %16 = tpu.iota {dimensions = array<i32: 0>} : vector<24x128xi32>
      %17 = vector.broadcast %7 : i32 to vector<24x128xi32>
      %18 = arith.addi %17, %16 : vector<24x128xi32>
      %19 = tpu.iota {dimensions = array<i32: 1>} : vector<24x128xi32>
      %20 = vector.broadcast %8 : i32 to vector<24x128xi32>
      %21 = arith.addi %20, %19 : vector<24x128xi32>
      %c0_8 = arith.constant 0 : index
      %c0_9 = arith.constant 0 : index
      %22 = vector.load %arg5[%c0_8, %c0_9] : memref<24x128xf32, #tpu.memory_space<vmem>>, vector<24x128xf32>
      %23 = arith.cmpi eq, %18, %21 : vector<24x128xi32>
      %c0_10 = arith.constant 0 : index
      %c0_11 = arith.constant 0 : index
      %24 = vector.load %arg4[%c0_10, %c0_11] : memref<1x1xf32, #tpu.memory_space<vmem>>, vector<1x1xf32>
      %cst_12 = arith.constant 0.000000e+00 : f32
      %25 = vector.shape_cast %24 : vector<1x1xf32> to vector<1x1xf32>
      %26 = vector.broadcast %25 : vector<1x1xf32> to vector<24x128xf32>
      %27 = vector.broadcast %cst_12 : f32 to vector<24x128xf32>
      %28 = arith.select %23, %26, %27 : vector<24x128xi1>, vector<24x128xf32>
      %29 = arith.addf %22, %28 : vector<24x128xf32>
      %c0_13 = arith.constant 0 : index
      %c0_14 = arith.constant 0 : index
      %30 = vector.load %arg5[%c0_13, %c0_14] : memref<24x128xf32, #tpu.memory_space<vmem>>, vector<24x128xf32>
      tpu.vector_store %arg5[%c0_13, %c0_14], %29 {strides = array<i32>} : memref<24x128xf32, #tpu.memory_space<vmem>>, vector<24x128xf32>,
    } else {
    }
    return
  }
  func.func @transform_0(%arg0: i32, %arg1: i32) -> (i32, i32) {
    %c0_i32 = arith.constant 0 : i32
    %c0_i32_0 = arith.constant 0 : i32
    return %arg0, %c0_i32 : i32, i32
  }
  func.func @transform_1(%arg0: i32, %arg1: i32) -> (i32, i32) {
    %c0_i32 = arith.constant 0 : i32
    %c0_i32_0 = arith.constant 0 : i32
    return %arg1, %c0_i32 : i32, i32
  }
  func.func @transform_2(%arg0: i32, %arg1: i32) -> (i32, i32) {
    %c0_i32 = arith.constant 0 : i32
    %c0_i32_0 = arith.constant 0 : i32
    %c0_i32_1 = arith.constant 0 : i32
    return %c0_i32, %c0_i32_0 : i32, i32
  }
  func.func @transform_3(%arg0: i32, %arg1: i32) -> (i32, i32) {
    %c0_i32 = arith.constant 0 : i32
    return %arg0, %arg1 : i32, i32
  }
}

</mosaic_0001>

<bundles_post_ra>
// kernel: tpu_custom_call.1
= control target key start
LH: loop header
LB: loop body
LE: loop exit
PB: predicated region body
PF: predicated region fallthrough
CT: control target
= control target key end

     0   :  { %s2475_s0 = inlined_call_operand.hbm [shape: f32[48,128], index: 0, kind: input, shape index: {}]   ;;  %s2476_s1 = inlined_call_operand.hbm [shape: f32[128,128], index: 1, kind: input, shape index: {}]   ;;  %s2477_s2 = inlined_call_operand.<no memory space> [shape: f32[1,1], index: 2, kind: input, shape index: {}]   ;;  %s2478_s3 = inlined_call_operand.hbm [shape: f32[48,128], index: 3, kind: output, shape index: {}]  }
   0x1   :  { %v8_v0 = vstv %s2477_s2 }
   0x2   :  { %9 = vst [vmem:[#allocation2] sm:$0x1] %v8_v0 }
   0x3   :  { %10 = vsyncpa [#allocation4], 0 }
   0x4   :  { %12 = vsyncpa [#allocation4 + $0x1], 0 }
   0x5   :  { %13 = vsyncpa [#allocation7], 0 }
   0x6   :  { %14 = vsyncpa [#allocation5], 0 }
   0x7   :  { %16 = vsyncpa [#allocation5 + $0x1], 0  ;;  %s1962_s14 = smov 0   ;;  %s1964_s15 = smov 0  }
   0x8   :  { %s1966_s16 = smov 0   ;;  %s1968_s17 = smov 0  }
   0x9   :  { %s1970_s18 = smov 0   ;;  %s1972_s19 = smov 0  }
   0xa LB: > { %s1146_s2 = sadd.s32 4294967295, %s1926_s19   ;;  %s1147_s20 = sadd.s32 4294967294, %s1926_s19   ;;  %s1926_s19 = sphi %s1972_s19, %s22_s19   ;;  %s1922_s18 = sphi %s1970_s18, %s2502_s18   ;;  %s1918_s17 = sphi %s1968_s17, %s2501_s17   ;;  %s1914_s16 = sphi %s1966_s16, %s2500_s16   ;;  %s1910_s15 = sphi %s1964_s15, %s2499_s15   ;;  %s1906_s14 = sphi %s1962_s14, %s2498_s14  }
   0xb   : > { %p54_p0 = scmp.ne.s32.totalorder %s1910_s15, %s1906_s14  ;;  %p1996_p1 = scmp.eq.s32.totalorder %s1146_s2, 0 }
   0xc   : > { %p2000_p2 = scmp.eq.s32.totalorder %s1146_s2, 1  ;;  %p133_p3 = scmp.eq.s32.totalorder %s1147_s20, 1 }
   0xd   : > { %s2483_s21 = scalar_select %p1996_p1, 1, 0 }
   0xe   : > { %s2484_s22 = scalar_select %p2000_p2, 1, 0 }
   0xf   : > { %p2006_p4 = por %p1996_p1, %p54_p0  ;;  %p1148_p5 = scmp.ge.s32.totalorder %s1926_s19, 1 }
  0x10   : > { %p2011_p6 = por %p133_p3, %p54_p0  ;;  %p140_p7 = scmp.lt.s32.totalorder %s1926_s19, 3 }
  0x11   : > { %s2485_s23 = scalar_select %p2006_p4, 1, 0 }
  0x12   : > { %s2486_s24 = scalar_select %p2011_p6, 1, 0 }
  0x13   : > { %p2016_p8 = pnand %p1148_p5, %p140_p7  ;;  %s1928_s26 = smov [#allocation6]  }
  0x14   : > { %s155_s27 = sshll.u32 %s1928_s26, 4  ;;  %s34_s29 = sadd.s32 1, %s1922_s18  ;;  %s156_s27 = int_to_ptr.vmem [resolvable:$true] %s155_s27 }
  0x15   : > { %s2487_s25 = scalar_select %p2016_p8, 1, 0 }
  0x16   : > { %p1702_p9 = pneg %p2016_p8  ;;  %s1782_s5 = scalar_lea.hbm %s2476_s1, 2048 }
  0x17   : > { %p1783_p12 = scmp.ne.s32.totalorder %s2476_s1, %s1782_s5  ;;  %p1789_p5 = scmp.lt.u32.totalorder %s1782_s5, %s2476_s1 }
  0x18   : > { %p2025_p11 = pnand %p1702_p9, %p1996_p1 }
  0x1a   : > { %p1784_p13 = pneg %p2025_p11 }
  0x1c   : > { %p1785_p0 = pnand %p1784_p13, %p1783_p12 }
  0x1e   : > { %p1786_p3 = pneg %p1785_p0 }
  0x20   : > { %p1791_p7 = pnand %p1789_p5, %p1786_p3 }
  0x22   : > { %1794 = shalt.err (!%p1791_p7)
}
  0x23   : > { %s1795_s10 = scalar_lea.vmem %s156_s27, 2048  ;;  %p1803_p1 = scmp.lt.s32.totalorder %s156_s27, %s156_s27 }
  0x24   : > { %p1796_p9 = scmp.ne.s32.totalorder %s156_s27, %s1795_s10  ;;  %p1804_p4 = scmp.lt.s32.totalorder %s1795_s10, %s1795_s10 }
  0x26   : > { %p1798_p10 = pnand %p1796_p9, %p1784_p13  ;;  %p1805_p8 = por %p1804_p4, %p1803_p1 }
  0x28   : > { %p1799_p6 = pneg %p1798_p10 }
  0x2a   : > { %p1806_p2 = pnand %p1805_p8, %p1799_p6 }
  0x2c   : > { %1809 = shalt.err (!%p1806_p2)
}
  0x2d   : > { %s1929_s11 = smov 128   ;;  %s1930_s12 = smov 8  }
  0x2e   : > { %1705 = dma.hbm_to_vmem [thread:$0]  (!%p2025_p11), %s2476_s1, 2048, %s156_s27, [#allocation7], %s1929_s11, %s1929_s11, %s1930_s12  }
  0x2f   : > { %p36_p1 = scmp.ge.s32.totalorder %s34_s29, 2  ;;  %s41_s20 = sadd.s32 1, %s1914_s16 }
  0x30   : > { %p48_p2 = scmp.ne.s32.totalorder %s1914_s16, %s1910_s15  ;;  %p49_p4 = scmp.eq.s32.totalorder %s1926_s19, 0 }
  0x31   : > { %s2504_s29 = smov (%p36_p1, %s34_s29), 0  ;;  %p2489_p8 = scmp.ne.s32.totalorder %s2484_s22, 0 }
  0x32   : > { %p50_p6 = por %p49_p4, %p48_p2  ;;  %s38_s28 = ssub.s32 %s1922_s18, %s2504_s29 }
  0x33   : > { %p2057_p10 = por %p2489_p8, %p48_p2  ;;  %p1715_p12 = scmp.lt.s32.totalorder %s1926_s19, 2 }
  0x34   : > { %p39_p13 = scmp.eq.s32.totalorder %s38_s28, 0  ;;  %s172_s30 = sand.u32 1, %s1914_s16  }
  0x35   : > { %s1692_s4 = smul.u32 24, %s172_s30  ;;  %p2069_p11 = pnand %p1715_p12, %p50_p6 }
  0x36   : > { %s2066_s5 = scalar_select %p39_p13, %s1914_s16, %s41_s20  }
  0x37   : > { %s1159_s27 = smul.u32 384, %s1922_s18  ;;  %s176_s6 = scalar_lea.vmem [#allocation3], %s1692_s4 }
  0x38   : > { %s183_s7 = sshll.u32 %s176_s6, 4  ;;  %s2080_s13 = scalar_lea.sflag [#allocation4], %s172_s30  ;;  %s2078_s7 = int_to_ptr.vmem [resolvable:$true] %s183_s7 }
  0x39   : > { %s2076_s10 = scalar_lea.hbm %s2475_s0, %s1159_s27  ;;  %p1812_p3 = pneg %p2069_p11 }
  0x3a   : > { %s1810_s2 = scalar_lea.hbm %s2076_s10, 384  ;;  %s1815_s4 = scalar_lea.hbm %s2475_s0, 768 }
  0x3b   : > { %p1811_p0 = scmp.ne.s32.totalorder %s2076_s10, %s1810_s2  ;;  %p1816_p9 = scmp.lt.u32.totalorder %s2076_s10, %s2475_s0 }
  0x3c   : > { %p1817_p1 = scmp.lt.u32.totalorder %s1815_s4, %s1810_s2  ;;  %p1819_p4 = scmp.lt.u32.totalorder %s1810_s2, %s2076_s10 }
  0x3d   : > { %p1813_p5 = pnand %p1812_p3, %p1811_p0 }
  0x3e   : > { %p1818_p2 = por %p1817_p1, %p1816_p9 }
  0x3f   : > { %p1814_p7 = pneg %p1813_p5 }
  0x40   : > { %p1820_p6 = por %p1819_p4, %p1818_p2 }
  0x42   : > { %p1821_p8 = pnand %p1820_p6, %p1814_p7 }
  0x44   : > { %1824 = shalt.err (!%p1821_p8)
}
  0x45   : > { %s1825_s30 = scalar_lea.vmem %s2078_s7, 384  ;;  %s1931_s9 = smov [#allocation3]  }
  0x46   : > { %p1826_p12 = scmp.ne.s32.totalorder %s2078_s7, %s1825_s30  ;;  %s1830_s22 = sshll.u32 %s1931_s9, 4  ;;  %s1831_s22 = int_to_ptr.vmem [resolvable:$false] %s1830_s22 }
  0x47   : > { %s1832_s20 = scalar_lea.vmem %s1831_s22, 768  ;;  %p1833_p5 = scmp.lt.s32.totalorder %s2078_s7, %s1831_s22 }
  0x48   : > { %p1828_p13 = pnand %p1826_p12, %p1812_p3  ;;  %p1834_p9 = scmp.lt.s32.totalorder %s1832_s20, %s1825_s30 }
  0x4a   : > { %p1829_p0 = pneg %p1828_p13  ;;  %p1835_p1 = por %p1834_p9, %p1833_p5 }
  0x4c   : > { %p1836_p2 = pnand %p1835_p1, %p1829_p0 }
  0x4e   : > { %1839 = shalt.err (!%p1836_p2)
}
  0x4f   : > { %1709 = dma.hbm_to_vmem [thread:$0]  (!%p2069_p11), %s2076_s10, 384, %s2078_s7, %s2080_s13, %s1929_s11, %s1929_s11, %s1930_s12  }
  0x50   : > { %p2492_p3 = scmp.ne.s32.totalorder %s2487_s25, 0 }
  0x51   : > { %s2114_s2 = sand.u32 (!%p2492_p3), 1, %s1910_s15   ;;  %p2493_p7 = scmp.ne.s32.totalorder (!%p2492_p3), %s2485_s23, 0 }
  0x52   : > { %195 = sbr.rel (%p2492_p3) target bundleno = 564 (0x234), region = 32  ;;  %s198_s4 = scalar_lea.sflag (!%p2492_p3), [#allocation4], %s2114_s2 }
  0x53   : > { %s1693_s28 = smul.u32 (!%p2492_p3), 24, %s2114_s2 }
  0x55   : > { %s2120_s8 = scalar_lea.vmem (!%p2492_p3), [#allocation3], %s1693_s28 }
  0x59   : > { %1893 = dma.done.wait (%p2493_p7), %s198_s4, 384  }
  0x5a   : > { %1895 = vsyncadd (%p2493_p7), %s198_s4, 4294966912  ;;  %p2494_p11 = scmp.ne.s32.totalorder %s2483_s21, 0 }
  0x5c   : > { %1897 = dma.done.wait (%p2494_p11), [#allocation7], 2048  }
  0x5d   : > { %1899 = vsyncadd (%p2494_p11), [#allocation7], 4294965248  ;;  %v1932_v1 = vmov 0.0|0.0   ;;  %vm1933_vm0 = vmmov 0   ;;  %v1934_v2 = vmov 0.0   ;;  %v234_v3 = vld [vmem:[#allocation6] sm:$0xff] }
  0x5e   : > { %1521 = vmatprep.subr.bf16.mxu1 %v1932_v1  ;;  %1593 = vmatprep.subr.bf16.mxu0 %v1932_v1  ;;  %v235_v4 = vld [vmem:[#allocation6 + $0x8] sm:$0xff]  ;;  %v251_v5 = vand.u32 4294901760, %v234_v3  ;;  %v236_v7 = vld [vmem:[#allocation6 + $0x10] sm:$0xff]  ;;  %v237_v8 = vld [vmem:[#allocation6 + $0x18] sm:$0xff]  ;;  %s2395_s21 = smul.u32 24, %s1918_s17  ;;  %s2405_s11 = scalar_lea.vmem [#allocation8], %s1693_s28 }
  0x5f   : > { %1307 = vmatprep.mubr.msk.f32.mxu1 %vm1933_vm0, %v1934_v2  ;;  %1430 = vmatprep.mubr.msk.f32.mxu0 %vm1933_vm0, %v1934_v2  ;;  %v254_v6 = vand.u32 4294901760, %v235_v4  ;;  %v257_v10 = vand.u32 4294901760, %v236_v7  ;;  %v260_v11 = vand.u32 4294901760, %v237_v8  ;;  %v238_v13 = vld [vmem:[#allocation6 + $0x20] sm:$0xff]  ;;  %v239_v14 = vld [vmem:[#allocation6 + $0x28] sm:$0xff]  ;;  %v240_v18 = vld [vmem:[#allocation6 + $0x30] sm:$0xff] }
  0x60   : > { %v263_v15 = vand.u32 4294901760, %v238_v13  ;;  %v266_v16 = vand.u32 4294901760, %v239_v14  ;;  %v241_v19 = vld [vmem:[#allocation6 + $0x38] sm:$0xff]  ;;  %v269_v20 = vand.u32 4294901760, %v240_v18  ;;  %v242_v22 = vld [vmem:[#allocation6 + $0x40] sm:$0xff]  ;;  %v243_v23 = vld [vmem:[#allocation6 + $0x48] sm:$0xff]  ;;  %v2156_v25 = vsub.f32 %v234_v3, %v251_v5 }
  0x61   : > { %v2136_v9 = vpack.c.bf16 %v254_v6, %v251_v5  ;;  %v2142_v12 = vpack.c.bf16 %v260_v11, %v257_v10  ;;  %v272_v21 = vand.u32 4294901760, %v241_v19  ;;  %v2158_v26 = vsub.f32 %v235_v4, %v254_v6  ;;  %v244_v40 = vld [vmem:[#allocation6 + $0x50] sm:$0xff]  ;;  %v245_v41 = vld [vmem:[#allocation6 + $0x58] sm:$0xff]  ;;  %v246_v50 = vld [vmem:[#allocation6 + $0x60] sm:$0xff]  ;;  %s993_s23 = sadd.s32 24, %s2395_s21  ;;  %p992_p4 = scmp.lt.s32.totalorder %s2395_s21, 128 }
  0x62   : > { %v2148_v17 = vpack.c.bf16 %v266_v16, %v263_v15  ;;  %v2160_v27 = vsub.f32 %v236_v7, %v257_v10  ;;  %v275_v28 = vand.u32 4294901760, %v242_v22  ;;  %v2162_v29 = vsub.f32 %v237_v8, %v260_v11  ;;  %v247_v51 = vld [vmem:[#allocation6 + $0x68] sm:$0xff]  ;;  %v248_v59 = vld [vmem:[#allocation6 + $0x70] sm:$0xff]  ;;  %v249_v60 = vld [vmem:[#allocation6 + $0x78] sm:$0xff]  ;;  %p1154_p6 = scmp.gt.s32.totalorder %s993_s23, 0 }
  0x63   : > { %1523 = vmatpush3.bf16.xpose.msra.mxu1 %v2136_v9  ;;  %1595 = vmatpush3.bf16.xpose.msra.mxu0 %v2136_v9  ;;  %v2154_v24 = vpack.c.bf16 %v272_v21, %v269_v20  ;;  %v2164_v30 = vsub.f32 %v238_v13, %v263_v15  ;;  %v2166_v31 = vsub.f32 %v239_v14, %v266_v16  ;;  %v278_v32 = vand.u32 4294901760, %v243_v23  ;;  %v231_v57 = vld [vmem:[%s2120_s8] sm:$0xff]  ;;  %v232_v63 = vld [vmem:[%s2120_s8 + $0x8] sm:$0xff]  ;;  %v233_v11 = vld [vmem:[%s2120_s8 + $0x10] sm:$0xff] }
  0x64   : > { %1524 = vmatprep.subr.bf16.mxu1 %v1932_v1  ;;  %1596 = vmatprep.subr.bf16.mxu0 %v1932_v1  ;;  %v2168_v33 = vsub.f32 %v240_v18, %v269_v20  ;;  %v2170_v34 = vsub.f32 %v241_v19, %v272_v21  ;;  %v2172_v35 = vsub.f32 %v242_v22, %v275_v28  ;;  %v281_v45 = vand.u32 4294901760, %v244_v40  ;;  %p2399_p8 = pnand %p1154_p6, %p992_p4 }
  0x65   : > { %v1570_v36 = vpack.c.bf16 %v2158_v26, %v2156_v25  ;;  %v2178_v37 = vsub.f32 %v243_v23, %v278_v32  ;;  %v1573_v38 = vpack.c.bf16 %v2162_v29, %v2160_v27  ;;  %v1576_v39 = vpack.c.bf16 %v2166_v31, %v2164_v30 }
  0x66   : > { %v1579_v42 = vpack.c.bf16 %v2170_v34, %v2168_v33  ;;  %v2190_v44 = vpack.c.bf16 %v278_v32, %v275_v28  ;;  %v284_v46 = vand.u32 4294901760, %v245_v41  ;;  %v2192_v47 = vsub.f32 %v244_v40, %v281_v45 }
  0x67   : > { %v1582_v43 = vpack.c.bf16 %v2178_v37, %v2172_v35  ;;  %v287_v53 = vand.u32 4294901760, %v246_v50  ;;  %v290_v54 = vand.u32 4294901760, %v247_v51  ;;  %v2215_v61 = vand.u32 4294901760, %v231_v57 }
  0x68   : > { %v2194_v48 = vsub.f32 %v245_v41, %v284_v46  ;;  %v2202_v52 = vpack.c.bf16 %v284_v46, %v281_v45  ;;  %v293_v0 = vand.u32 4294901760, %v248_v59  ;;  %v296_v3 = vand.u32 4294901760, %v249_v60 }
  0x69   : > { %v2204_v55 = vsub.f32 %v246_v50, %v287_v53  ;;  %v2206_v56 = vsub.f32 %v247_v51, %v290_v54  ;;  %v2217_v62 = vpack.c.bf16 %v290_v54, %v287_v53  ;;  %v2225_v6 = vsub.f32 %v231_v57, %v2215_v61 }
  0x6a   : > { %v1585_v49 = vpack.c.bf16 %v2194_v48, %v2192_v47  ;;  %v2220_v4 = vsub.f32 %v248_v59, %v293_v0  ;;  %v2222_v5 = vsub.f32 %v249_v60, %v296_v3  ;;  %v2227_v7 = vand.u32 4294901760, %v232_v63 }
  0x6b   : > { %1526 = vmatpush3.bf16.xpose.msra.mxu1 %v2142_v12  ;;  %1598 = vmatpush3.bf16.xpose.msra.mxu0 %v2142_v12  ;;  %v1588_v58 = vpack.c.bf16 %v2206_v56, %v2204_v55  ;;  %v364_v8 = vand.u32 4294901760, %v2156_v25  ;;  %v371_v10 = vand.u32 4294901760, %v2158_v26  ;;  %v333_v14 = vand.u32 4294901760, %v2225_v6 }
  0x6c   : > { %1527 = vmatprep.subr.bf16.mxu1 %v1932_v1  ;;  %1599 = vmatprep.subr.bf16.mxu0 %v1932_v1  ;;  %v1591_v13 = vpack.c.bf16 %v2222_v5, %v2220_v4  ;;  %v2240_v15 = vsub.f32 %v232_v63, %v2227_v7  ;;  %v2242_v16 = vand.u32 4294901760, %v233_v11  ;;  %v2244_v18 = vpack.c.bf16 %v296_v3, %v293_v0 }
  0x6d   : > { %v365_v19 = vsub.f32 %v2156_v25, %v364_v8  ;;  %v372_v20 = vsub.f32 %v2158_v26, %v371_v10  ;;  %v334_v21 = vsub.f32 %v2225_v6, %v333_v14  ;;  %v378_v40 = vand.u32 4294901760, %v2160_v27 }
  0x6e   : > { %v343_v22 = vand.u32 4294901760, %v2240_v15  ;;  %v2251_v23 = vsub.f32 %v233_v11, %v2242_v16  ;;  %v385_v41 = vand.u32 4294901760, %v2162_v29  ;;  %v1618_v53 = vpack.c.bf16 %v371_v10, %v364_v8 }
  0x6f   : > { %v366_v28 = vand.u32 4294901760, %v365_v19  ;;  %v373_v32 = vand.u32 4294901760, %v372_v20  ;;  %v335_v45 = vand.u32 4294901760, %v334_v21  ;;  %v379_v54 = vsub.f32 %v2160_v27, %v378_v40 }
  0x70   : > { %v344_v46 = vsub.f32 %v2240_v15, %v343_v22  ;;  %v353_v50 = vand.u32 4294901760, %v2251_v23  ;;  %v386_v57 = vsub.f32 %v2162_v29, %v385_v41  ;;  %v392_v3 = vand.u32 4294901760, %v2164_v30 }
  0x71   : > { %v1546_v51 = vpack.c.bf16 %v373_v32, %v366_v28  ;;  %v380_v63 = vand.u32 4294901760, %v379_v54  ;;  %v399_v11 = vand.u32 4294901760, %v2166_v31  ;;  %v1621_v8 = vpack.c.bf16 %v385_v41, %v378_v40 }
  0x72   : > { %v345_v59 = vand.u32 4294901760, %v344_v46  ;;  %v354_v60 = vsub.f32 %v2251_v23, %v353_v50  ;;  %v387_v0 = vand.u32 4294901760, %v386_v57  ;;  %v393_v19 = vsub.f32 %v2164_v30, %v392_v3 }
  0x73   : > { %1529 = vmatpush3.bf16.xpose.msra.mxu1 %v2148_v17  ;;  %1601 = vmatpush3.bf16.xpose.msra.mxu0 %v2148_v17  ;;  %v400_v20 = vsub.f32 %v2166_v31, %v399_v11  ;;  %v413_v32 = vand.u32 4294901760, %v2170_v34  ;;  %v1624_v41 = vpack.c.bf16 %v399_v11, %v392_v3  ;;  %v427_v54 = vand.u32 4294901760, %v2178_v37 }
  0x74   : > { %1530 = vmatprep.subr.bf16.mxu1 %v1932_v1  ;;  %1602 = vmatprep.subr.bf16.mxu0 %v1932_v1  ;;  %v355_v10 = vand.u32 4294901760, %v354_v60  ;;  %v394_v21 = vand.u32 4294901760, %v393_v19  ;;  %v434_v11 = vand.u32 4294901760, %v2192_v47 }
  0x75   : > { %v401_v28 = vand.u32 4294901760, %v400_v20  ;;  %v414_v46 = vsub.f32 %v2170_v34, %v413_v32 }
  0x76   : > { %v435_v19 = vsub.f32 %v2192_v47, %v434_v11 }
  0x77   : > { %v1552_v40 = vpack.c.bf16 %v401_v28, %v394_v21 }
  0x78   : > { %v436_v21 = vand.u32 4294901760, %v435_v19 }
  0x7b   : > { %1532 = vmatpush3.bf16.xpose.msra.mxu1 %v2154_v24  ;;  %1604 = vmatpush3.bf16.xpose.msra.mxu0 %v2154_v24 }
  0x7c   : > { %1533 = vmatprep.subr.bf16.mxu1 %v1932_v1  ;;  %1605 = vmatprep.subr.bf16.mxu0 %v1932_v1 }
  0x83   : > { %1535 = vmatpush3.bf16.xpose.msra.mxu1 %v2190_v44  ;;  %1607 = vmatpush3.bf16.xpose.msra.mxu0 %v2190_v44 }
  0x84   : > { %1536 = vmatprep.subr.bf16.mxu1 %v1932_v1  ;;  %1608 = vmatprep.subr.bf16.mxu0 %v1932_v1 }
  0x8b   : > { %1538 = vmatpush3.bf16.xpose.msra.mxu1 %v2202_v52  ;;  %1610 = vmatpush3.bf16.xpose.msra.mxu0 %v2202_v52 }
  0x8c   : > { %1539 = vmatprep.subr.bf16.mxu1 %v1932_v1  ;;  %1611 = vmatprep.subr.bf16.mxu0 %v1932_v1 }
  0x93   : > { %1541 = vmatpush3.bf16.xpose.msra.mxu1 %v2217_v62  ;;  %1613 = vmatpush3.bf16.xpose.msra.mxu0 %v2217_v62 }
  0x94   : > { %1542 = vmatprep.subr.bf16.mxu1 %v1932_v1  ;;  %1614 = vmatprep.subr.bf16.mxu0 %v1932_v1 }
  0x9b   : > { %1544 = vmatpush3.bf16.xpose.msra.mxu1 %v2244_v18  ;;  %1616 = vmatpush3.bf16.xpose.msra.mxu0 %v2244_v18 }
  0x9c   : > { %1545 = vmatprep.subr.bf16.mxu1 %v1932_v1  ;;  %1617 = vmatprep.subr.bf16.mxu0 %v1932_v1 }
  0xa2   : > { %1308 = vmatmul.mubr.f32.vlgmr.msra.gmra.mrb[0].mxu1 %v335_v45  ;;  %1431 = vmatmul.mubr.f32.vlgmr.msra.gmra.mrb[0].mxu0 %v333_v14  ;;  %v1549_v14 = vpack.c.bf16 %v387_v0, %v380_v63  ;;  %v428_v63 = vsub.f32 %v2178_v37, %v427_v54 }
  0xa3   : > { %1547 = vmatpush3.bf16.xpose.msra.mxu1 %v1546_v51  ;;  %1619 = vmatpush3.bf16.xpose.msra.mxu0 %v1618_v53  ;;  %v415_v51 = vand.u32 4294901760, %v414_v46  ;;  %v420_v53 = vand.u32 4294901760, %v2172_v35 }
  0xa4   : > { %1548 = vmatprep.subr.bf16.mxu1 %v1932_v1  ;;  %1620 = vmatprep.subr.bf16.mxu0 %v1932_v1  ;;  %v429_v3 = vand.u32 4294901760, %v428_v63 }
  0xa5   : > { %1310 = vmatprep.mubr.msk.f32.mxu1 %vm1933_vm0, %v1934_v2  ;;  %1433 = vmatprep.mubr.msk.f32.mxu0 %vm1933_vm0, %v1934_v2  ;;  %v421_v60 = vsub.f32 %v2172_v35, %v420_v53 }
  0xa6   : > { %1311 = vmatmul.mubr.f32.gmra.mrb[2].mxu1 %v345_v59  ;;  %1434 = vmatmul.mubr.f32.gmra.mrb[2].mxu0 %v343_v22  ;;  %v406_v22 = vand.u32 4294901760, %v2168_v33 }
  0xa7   : > { %1313 = vmatprep.mubr.msk.f32.mxu1 %vm1933_vm0, %v1934_v2  ;;  %1436 = vmatprep.mubr.msk.f32.mxu0 %vm1933_vm0, %v1934_v2  ;;  %v422_v0 = vand.u32 4294901760, %v421_v60 }
  0xa8   : > { %v407_v45 = vsub.f32 %v2168_v33, %v406_v22  ;;  %v1627_v59 = vpack.c.bf16 %v413_v32, %v406_v22  ;;  %v448_v22 = vand.u32 4294901760, %v2204_v55  ;;  %v455_v32 = vand.u32 4294901760, %v2206_v56 }
  0xaa   : > { %1314 = vmatmul.mubr.f32.gmra.mrb[4].mxu1 %v355_v10  ;;  %1437 = vmatmul.mubr.f32.gmra.mrb[4].mxu0 %v353_v50  ;;  %v408_v50 = vand.u32 4294901760, %v407_v45  ;;  %v1558_v10 = vpack.c.bf16 %v429_v3, %v422_v0  ;;  %v449_v45 = vsub.f32 %v2204_v55, %v448_v22  ;;  %v456_v46 = vsub.f32 %v2206_v56, %v455_v32 }
  0xab   : > { %1550 = vmatpush3.bf16.xpose.msra.mxu1 %v1549_v14  ;;  %1622 = vmatpush3.bf16.xpose.msra.mxu0 %v1621_v8  ;;  %v441_v8 = vand.u32 4294901760, %v2194_v48  ;;  %v1630_v14 = vpack.c.bf16 %v427_v54, %v420_v53  ;;  %v462_v53 = vand.u32 4294901760, %v2220_v4  ;;  %v469_v54 = vand.u32 4294901760, %v2222_v5 }
  0xac   : > { %1551 = vmatprep.subr.bf16.mxu1 %v1932_v1  ;;  %1623 = vmatprep.subr.bf16.mxu0 %v1932_v1  ;;  %v1555_v57 = vpack.c.bf16 %v415_v51, %v408_v50  ;;  %v450_v50 = vand.u32 4294901760, %v449_v45  ;;  %v457_v51 = vand.u32 4294901760, %v456_v46  ;;  %v999_v55 = vlaneseq (!%p2399_p8) }
  0xad   : > { %1348 = vmatprep.mubr.msk.f32.mxu1 %vm1933_vm0, %v1934_v2  ;;  %1471 = vmatprep.mubr.msk.f32.mxu0 %vm1933_vm0, %v1934_v2  ;;  %v442_v20 = vsub.f32 %v2194_v48, %v441_v8  ;;  %v463_v60 = vsub.f32 %v2220_v4, %v462_v53  ;;  %v470_v63 = vsub.f32 %v2222_v5, %v469_v54 }
  0xae   : > { %v1000_v56 = vshrl.u32 (!%p2399_p8), %v999_v55, 7 }
  0xaf   : > { %v443_v28 = vand.u32 4294901760, %v442_v20  ;;  %v464_v0 = vand.u32 4294901760, %v463_v60  ;;  %v471_v3 = vand.u32 4294901760, %v470_v63 }
  0xb3   : > { %1553 = vmatpush3.bf16.xpose.msra.mxu1 %v1552_v40  ;;  %1625 = vmatpush3.bf16.xpose.msra.mxu0 %v1624_v41  ;;  %v1561_v40 = vpack.c.bf16 %v443_v28, %v436_v21  ;;  %v1633_v41 = vpack.c.bf16 %v441_v8, %v434_v11  ;;  %v1567_v11 = vpack.c.bf16 %v471_v3, %v464_v0 }
  0xb4   : > { %1554 = vmatprep.subr.bf16.mxu1 %v1932_v1  ;;  %1626 = vmatprep.subr.bf16.mxu0 %v1932_v1  ;;  %v1639_v8 = vpack.c.bf16 %v469_v54, %v462_v53 }
  0xbb   : > { %1556 = vmatpush3.bf16.xpose.msra.mxu1 %v1555_v57  ;;  %1628 = vmatpush3.bf16.xpose.msra.mxu0 %v1627_v59  ;;  %v1564_v57 = vpack.c.bf16 %v457_v51, %v450_v50  ;;  %v1636_v59 = vpack.c.bf16 %v455_v32, %v448_v22 }
  0xbc   : > { %1557 = vmatprep.subr.bf16.mxu1 %v1932_v1  ;;  %1629 = vmatprep.subr.bf16.mxu0 %v1932_v1 }
  0xc3   : > { %1559 = vmatpush3.bf16.xpose.msra.mxu1 %v1558_v10  ;;  %1631 = vmatpush3.bf16.xpose.msra.mxu0 %v1630_v14 }
  0xc4   : > { %1560 = vmatprep.subr.bf16.mxu1 %v1932_v1  ;;  %1632 = vmatprep.subr.bf16.mxu0 %v1932_v1 }
  0xcb   : > { %1562 = vmatpush3.bf16.xpose.msra.mxu1 %v1561_v40  ;;  %1634 = vmatpush3.bf16.xpose.msra.mxu0 %v1633_v41 }
  0xcc   : > { %1563 = vmatprep.subr.bf16.mxu1 %v1932_v1  ;;  %1635 = vmatprep.subr.bf16.mxu0 %v1932_v1 }
  0xd3   : > { %1565 = vmatpush3.bf16.xpose.msra.mxu1 %v1564_v57  ;;  %1637 = vmatpush3.bf16.xpose.msra.mxu0 %v1636_v59 }
  0xd4   : > { %1566 = vmatprep.subr.bf16.mxu1 %v1932_v1  ;;  %1638 = vmatprep.subr.bf16.mxu0 %v1932_v1 }
  0xdb   : > { %1568 = vmatpush3.bf16.xpose.msra.mxu1 %v1567_v11  ;;  %1640 = vmatpush3.bf16.xpose.msra.mxu0 %v1639_v8 }
  0xdc   : > { %1569 = vmatprep.subr.bf16.mxu1 %v1932_v1  ;;  %1641 = vmatprep.subr.bf16.mxu0 %v1932_v1 }
  0xe2   : > { %1349 = vmatmul.mubr.f32.vlgmr.msra.gmra.mrb[0].mxu1 %v2215_v61  ;;  %1472 = vmatmul.mubr.f32.vlgmr.msra.gmra.mrb[0].mxu0 %v2215_v61 }
  0xe3   : > { %1571 = vmatpush3.bf16.xpose.msra.mxu1 %v1570_v36  ;;  %1643 = vmatpush3.bf16.xpose.msra.mxu0 %v2136_v9 }
  0xe4   : > { %1572 = vmatprep.subr.bf16.mxu1 %v1932_v1  ;;  %1644 = vmatprep.subr.bf16.mxu0 %v1932_v1 }
  0xe5   : > { %1351 = vmatprep.mubr.msk.f32.mxu1 %vm1933_vm0, %v1934_v2  ;;  %1474 = vmatprep.mubr.msk.f32.mxu0 %vm1933_vm0, %v1934_v2 }
  0xe6   : > { %1352 = vmatmul.mubr.f32.gmra.mrb[2].mxu1 %v2227_v7  ;;  %1475 = vmatmul.mubr.f32.gmra.mrb[2].mxu0 %v2227_v7 }
  0xe7   : > { %1354 = vmatprep.mubr.msk.f32.mxu1 %vm1933_vm0, %v1934_v2  ;;  %1477 = vmatprep.mubr.msk.f32.mxu0 %vm1933_vm0, %v1934_v2 }
  0xea   : > { %1355 = vmatmul.mubr.f32.gmra.mrb[4].mxu1 %v2242_v16  ;;  %1478 = vmatmul.mubr.f32.gmra.mrb[4].mxu0 %v2242_v16 }
  0xeb   : > { %1574 = vmatpush3.bf16.xpose.msra.mxu1 %v1573_v38  ;;  %1646 = vmatpush3.bf16.xpose.msra.mxu0 %v2142_v12 }
  0xec   : > { %1575 = vmatprep.subr.bf16.mxu1 %v1932_v1  ;;  %1647 = vmatprep.subr.bf16.mxu0 %v1932_v1 }
  0xed   : > { %1389 = vmatprep.mubr.msk.f32.mxu1 %vm1933_vm0, %v1934_v2  ;;  %1512 = vmatprep.mubr.msk.f32.mxu0 %vm1933_vm0, %v1934_v2 }
  0xf3   : > { %1577 = vmatpush3.bf16.xpose.msra.mxu1 %v1576_v39  ;;  %1649 = vmatpush3.bf16.xpose.msra.mxu0 %v2148_v17 }
  0xf4   : > { %1578 = vmatprep.subr.bf16.mxu1 %v1932_v1  ;;  %1650 = vmatprep.subr.bf16.mxu0 %v1932_v1 }
  0xfb   : > { %1580 = vmatpush3.bf16.xpose.msra.mxu1 %v1579_v42  ;;  %1652 = vmatpush3.bf16.xpose.msra.mxu0 %v2154_v24 }
  0xfc   : > { %1581 = vmatprep.subr.bf16.mxu1 %v1932_v1  ;;  %1653 = vmatprep.subr.bf16.mxu0 %v1932_v1 }
 0x103   : > { %1583 = vmatpush3.bf16.xpose.msra.mxu1 %v1582_v43  ;;  %1655 = vmatpush3.bf16.xpose.msra.mxu0 %v2190_v44 }
 0x104   : > { %1584 = vmatprep.subr.bf16.mxu1 %v1932_v1  ;;  %1656 = vmatprep.subr.bf16.mxu0 %v1932_v1 }
 0x10b   : > { %1586 = vmatpush3.bf16.xpose.msra.mxu1 %v1585_v49  ;;  %1658 = vmatpush3.bf16.xpose.msra.mxu0 %v2202_v52  ;;  %v1155_v49 = vld [vmem:[#allocation2] ss:$0 sm:$0xff] (!%p2399_p8)  ;;  %v1935_v52 = vmov (!%p2399_p8), 0  }
 0x10c   : > { %1587 = vmatprep.subr.bf16.mxu1 %v1932_v1  ;;  %1659 = vmatprep.subr.bf16.mxu0 %v1932_v1 }
 0x10d   : > { %1781 = vset.pattern.permute.xlu0 (!%p2399_p8), %v1935_v52 }
 0x10e   : > { %1024 = vperm.xlu0 (!%p2399_p8), %1781, %v1155_v49  }
 0x113   : > { %1589 = vmatpush3.bf16.xpose.msra.mxu1 %v1588_v58  ;;  %1661 = vmatpush3.bf16.xpose.msra.mxu0 %v2217_v62  ;;  %v1001_v58 = vadd.s32 (!%p2399_p8), 8, %v1000_v56  ;;  %v1003_v62 = vstv (!%p2399_p8), %s2395_s21 }
 0x114   : > { %1590 = vmatprep.subr.bf16.mxu1 %v1932_v1  ;;  %1662 = vmatprep.subr.bf16.mxu0 %v1932_v1  ;;  %v1004_v4 = vadd.s32 (!%p2399_p8), %v1003_v62, %v1000_v56 }
 0x115   : > { %v1005_v5 = vadd.s32 (!%p2399_p8), %v1003_v62, %v1001_v58 }
 0x11b   : > { %1592 = vmatpush3.bf16.xpose.msra.mxu1 %v1591_v13  ;;  %1664 = vmatpush3.bf16.xpose.msra.mxu0 %v2244_v18 }
 0x122   : > { %1390 = vmatmul.mubr.f32.vlgmr.msra.gmra.mrb[0].mxu1 %v2225_v6  ;;  %1513 = vmatmul.mubr.f32.vlgmr.msra.gmra.mrb[0].mxu0 %v2215_v61  ;;  %v1002_v61 = vadd.s32 (!%p2399_p8), 16, %v1000_v56 }
 0x123   : > { %1392 = vmatprep.mubr.msk.f32.mxu1 %vm1933_vm0, %v1934_v2  ;;  %1515 = vmatprep.mubr.msk.f32.mxu0 %vm1933_vm0, %v1934_v2 }
 0x124   : > { %v1006_v6 = vadd.s32 (!%p2399_p8), %v1003_v62, %v1002_v61 }
 0x126   : > { %1393 = vmatmul.mubr.f32.gmra.mrb[2].mxu1 %v2240_v15  ;;  %1516 = vmatmul.mubr.f32.gmra.mrb[2].mxu0 %v2227_v7  ;;  %v1008_v7 = vand.u32 (!%p2399_p8), 127, %v999_v55 }
 0x127   : > { %1395 = vmatprep.mubr.msk.f32.mxu1 %vm1933_vm0, %v1934_v2  ;;  %1518 = vmatprep.mubr.msk.f32.mxu0 %vm1933_vm0, %v1934_v2 }
 0x128   : > { %vm1014_vm1 = vcmp.eq.s32.totalorder (!%p2399_p8), %v1004_v4, %v1008_v7  ;;  %vm1015_vm2 = vcmp.eq.s32.totalorder (!%p2399_p8), %v1005_v5, %v1008_v7  ;;  %vm1016_vm3 = vcmp.eq.s32.totalorder (!%p2399_p8), %v1006_v6, %v1008_v7 }
 0x12a   : > { %1396 = vmatmul.mubr.f32.gmra.mrb[4].mxu1 %v2251_v23  ;;  %1519 = vmatmul.mubr.f32.gmra.mrb[4].mxu0 %v2242_v16 }
 0x18d   : > { %v1025_v18 = vpop.permute.xlu0 (!%p2399_p8), %1024 }
 0x18e   : > { %v1027_v23 = vsel (!%p2399_p8), %vm1014_vm1, %v1025_v18, 0.0  ;;  %v1028_v10 = vsel (!%p2399_p8), %vm1015_vm2, %v1025_v18, 0.0  ;;  %v1029_v14 = vsel (!%p2399_p8), %vm1016_vm3, %v1025_v18, 0.0 }
 0x1f5   : > { %v624_v1 = vpop.f32.mrb[0].mxu1  ;;  %v961_v9 = vpop.f32.mrb[0].mxu0 }
 0x1f6   : > { %v1665_v12 = vadd.f32 %v961_v9, %v624_v1  ;;  %v1391_v17 = vpop.f32.mrb[1].mxu1  ;;  %v1514_v2 = vpop.f32.mrb[1].mxu0 }
 0x1f8   : > { %v977_v24 = vmin.f32 %v1665_v12, 0.0 }
 0x1f9   : > { %v631_v25 = vpop.f32.mrb[2].mxu1  ;;  %v967_v26 = vpop.f32.mrb[2].mxu0 }
 0x1fa   : > { %v980_v27 = vmul.f32 1.442695, %v977_v24  ;;  %v1666_v29 = vadd.f32 %v967_v26, %v631_v25  ;;  %v1394_v30 = vpop.f32.mrb[3].mxu1  ;;  %v1517_v31 = vpop.f32.mrb[3].mxu0 }
 0x1fc   : > { %1775 = vpow2.f32 %v980_v27  ;;  %v978_v33 = vmin.f32 %v1666_v29, 0.0 }
 0x1fd   : > { %v638_v34 = vpop.f32.mrb[4].mxu1  ;;  %v973_v35 = vpop.f32.mrb[4].mxu0 }
 0x1fe   : > { %v982_v36 = vmul.f32 1.442695, %v978_v33  ;;  %v1667_v37 = vadd.f32 %v973_v35, %v638_v34  ;;  %v1397_v38 = vpop.f32.mrb[5].mxu1  ;;  %v1520_v39 = vpop.f32.mrb[5].mxu0 }
 0x200   : > { %1777 = vpow2.f32 %v982_v36  ;;  %v979_v42 = vmin.f32 %v1667_v37, 0.0 }
 0x202   : > { %v984_v43 = vmul.f32 1.442695, %v979_v42 }
 0x204   : > { %1779 = vpow2.f32 %v984_v43 }
 0x206   : > { %v1776_v44 = vpop.eup %1775 }
 0x207   : > { %986 = vst [vmem:[%s2405_s11] sm:$0xff] %v1776_v44 }
 0x209   : > { %998 = sbr.rel (%p2399_p8) target bundleno = 538 (0x21a), region = 44 }
 0x20a   : > { %v1778_v47 = vpop.eup %1777 }
 0x20b   : > { %987 = vst [vmem:[%s2405_s11 + $0x8] sm:$0xff] %v1778_v47 }
 0x20e   : > { %v1780_v48 = vpop.eup %1779  ;;  %v1011_v13 = vld [vmem:[%s2405_s11] sm:$0xff] (!%p2399_p8) }
 0x20f   : > { %988 = vst [vmem:[%s2405_s11 + $0x10] sm:$0xff] %v1780_v48  ;;  %v1030_v19 = vadd.f32 (!%p2399_p8), %v1027_v23, %v1011_v13 }
 0x211   : > { %1033 = vst [vmem:[%s2405_s11] sm:$0xff] %v1030_v19 }
 0x212   : > { %v1012_v15 = vld [vmem:[%s2405_s11 + $0x8] sm:$0xff] }
 0x213   : > { %v1031_v20 = vadd.f32 %v1028_v10, %v1012_v15 }
 0x215   : > { %1034 = vst [vmem:[%s2405_s11 + $0x8] sm:$0xff] %v1031_v20 }
 0x216   : > { %v1013_v16 = vld [vmem:[%s2405_s11 + $0x10] sm:$0xff] }
 0x217   : > { %v1032_v21 = vadd.f32 %v1029_v14, %v1013_v16 }
 0x219   : > { %1035 = vst [vmem:[%s2405_s11 + $0x10] sm:$0xff] %v1032_v21 }
 0x21a PF: > { %s1160_s12 = smul.u32 384, %s1918_s17  ;;  %s1051_s7 = sshll.u32 %s2405_s11, 4  ;;  %s2426_s7 = int_to_ptr.vmem [resolvable:$true] %s1051_s7 }
 0x21b   : > { %s1037_s6 = scalar_lea.sflag [#allocation5], %s2114_s2  ;;  %s1840_s30 = scalar_lea.vmem %s2426_s7, 384 }
 0x21c   : > { %s2424_s27 = scalar_lea.hbm %s2478_s3, %s1160_s12  ;;  %p1841_p12 = scmp.ne.s32.totalorder %s2426_s7, %s1840_s30 }
 0x21d   : > { %s1936_s9 = smov [#allocation8]  }
 0x21e   : > { %p1842_p13 = pnand %p1841_p12, %p2057_p10  ;;  %s1844_s22 = sshll.u32 %s1936_s9, 4  ;;  %s1845_s22 = int_to_ptr.vmem [resolvable:$false] %s1844_s22 }
 0x21f   : > { %s1846_s17 = scalar_lea.vmem %s1845_s22, 768  ;;  %p1847_p5 = scmp.lt.s32.totalorder %s2426_s7, %s1845_s22 }
 0x220   : > { %p1843_p0 = pneg %p1842_p13  ;;  %p1848_p9 = scmp.lt.s32.totalorder %s1846_s17, %s1840_s30 }
 0x222   : > { %p1849_p1 = por %p1848_p9, %p1847_p5 }
 0x224   : > { %p1850_p2 = pnand %p1849_p1, %p1843_p0 }
 0x226   : > { %1853 = shalt.err (!%p1850_p2)
}
 0x227   : > { %s1854_s20 = scalar_lea.hbm %s2424_s27, 384  ;;  %s1858_s8 = scalar_lea.hbm %s2478_s3, 768 }
 0x228   : > { %p1855_p3 = scmp.ne.s32.totalorder %s2424_s27, %s1854_s20  ;;  %p1859_p4 = scmp.lt.u32.totalorder %s2424_s27, %s2478_s3 }
 0x229   : > { %p1860_p6 = scmp.lt.u32.totalorder %s1858_s8, %s1854_s20  ;;  %p1862_p12 = scmp.lt.u32.totalorder %s1854_s20, %s2424_s27 }
 0x22a   : > { %p1856_p7 = pnand %p1855_p3, %p2057_p10 }
 0x22b   : > { %p1861_p8 = por %p1860_p6, %p1859_p4 }
 0x22c   : > { %p1857_p11 = pneg %p1856_p7 }
 0x22d   : > { %p1863_p13 = por %p1862_p12, %p1861_p8 }
 0x22f   : > { %p1864_p0 = pnand %p1863_p13, %p1857_p11 }
 0x231   : > { %1867 = shalt.err (!%p1864_p0)
}
 0x232   : > { %s1937_s25 = smov 128   ;;  %s1938_s11 = smov 8  }
 0x233   : > { %1700 = dma.vmem_to_hbm [thread:$0]  (%p2057_p10), %s2426_s7, 384, %s2424_s27, %s1037_s6, %s1937_s25, %s1937_s25, %s1938_s11  }
 0x234 PF: > { %s1066_s12 = sand.u32 1, %s1906_s14   ;;  %p2496_p5 = scmp.ne.s32.totalorder %s2486_s24, 0 }
 0x235   : > { %p2497_p9 = scmp.ge.s32.totalorder %s1926_s19, 2  ;;  %s1067_s10 = scalar_lea.sflag [#allocation5], %s1066_s12 }
 0x237   : > { %p1711_p1 = pnand %p2497_p9, %p2496_p5 }
 0x239   : > { %1901 = dma.done.wait (!%p1711_p1), %s1067_s10, 384  }
 0x23a   : > { %1903 = vsyncadd (!%p1711_p1), %s1067_s10, 4294966912  ;;  %s22_s19 = sadd.s32 1, %s1926_s19   ;;  %s2498_s14 = smov %s1910_s15 }
 0x23b   : > { %p19_p2 = scmp.ge.s32.totalorder %s22_s19, 4   ;;  %s2499_s15 = smov %s1914_s16 }
 0x23c   : > { %s2500_s16 = smov %s2066_s5  ;;  %s2501_s17 = smov %s1922_s18 }
 0x23d   : > { %s2502_s18 = smov %s2504_s29  ;;  %21 = sbr.rel (!%p19_p2) target bundleno = 10 (0xa), region = 86 }
 0x244   :  { %1072 = vsyncpa [#allocation4], 1 }
 0x245   :  { %1074 = vsyncpa [#allocation4 + $0x1], 1 }
 0x246   :  { %1075 = vsyncpa [#allocation7], 1 }
 0x247   :  { %1076 = vsyncpa [#allocation5], 1 }
 0x248   :  { %1078 = vsyncpa [#allocation5 + $0x1], 1 }

</bundles_post_ra>
